<compile_context>
chip_gen: v7x
topology: tpu7x:2x2x1
jax: 0.10.0
libtpu: 0.0.40
codegen_flags: <defaults>
</compile_context>

<pallas_src>
import functools
import itertools

import numpy as np
import jax
import jax.numpy as jnp
from jax.experimental import pallas as pl
from jax.experimental.pallas import tpu as pltpu

_LANE = 128
_SUBLANE = 8
_VMEM_BUDGET = 24 * 1024 * 1024   # tile-selection budget (safe on v5e/v6e/v7x)
_VMEM_LIMIT = 48 * 1024 * 1024    # scoped VMEM limit handed to Mosaic


# --------------------------------------------------------------------------- #
# pure-python bookkeeping
# --------------------------------------------------------------------------- #
def _round_up(x, m):
    return -(-x // m) * m


def signature_channels(channels: int, depth: int) -> int:
    return sum(channels ** k for k in range(1, depth + 1))


def _level_sizes_offsets(channels: int, depth: int):
    sizes = [channels ** k for k in range(1, depth + 1)]
    offs = [0]
    for s in sizes:
        offs.append(offs[-1] + s)
    return sizes, offs


def _padded_layout(channels: int, depth: int):
    """Per-level sizes and 8-row-aligned start offsets of the padded layout."""
    sizes, _ = _level_sizes_offsets(channels, depth)
    sizes8 = [_round_up(s, _SUBLANE) for s in sizes]
    offs8 = [0]
    for s in sizes8:
        offs8.append(offs8[-1] + s)
    return sizes, sizes8, offs8


def _lyndon_local_indices(channels: int, depth: int):
    """Per-level local indices (into that level's C^k block) of the Lyndon
    words, in signatory's 'words' ordering (length, then lexicographic)."""
    per_level = []
    for length in range(1, depth + 1):
        idx = []
        for w in itertools.product(range(channels), repeat=length):
            # Lyndon word: strictly smaller than every proper rotation.
            if all((w[r:] + w[:r]) > w for r in range(1, length)):
                loc = 0
                for letter in w:
                    loc = loc * channels + letter
                idx.append(loc)
        per_level.append(idx)          # already sorted (lex == numeric order)
    return per_level


def _lyndon_word_indices(channels: int, depth: int) -> np.ndarray:
    _, offs = _level_sizes_offsets(channels, depth)
    flat = []
    for k, idx in enumerate(_lyndon_local_indices(channels, depth)):
        flat.extend(offs[k] + i for i in idx)
    return np.asarray(flat, dtype=np.int32)


def logsignature_channels(channels: int, depth: int) -> int:
    return sum(len(v) for v in _lyndon_local_indices(channels, depth))


def _output_runs(channels: int, depth: int, mode: str):
    """Static copy runs (out_offset, level, level_local_offset, length) for the
    kernel epilogue.  'expand' -> one run per level; 'words' -> contiguous runs
    of Lyndon-word rows (the gather is fused into the kernel)."""
    sizes, offs = _level_sizes_offsets(channels, depth)
    runs = []
    if mode == "expand":
        for k in range(depth):
            runs.append((offs[k], k, 0, sizes[k]))
        return tuple(runs), offs[-1]
    # mode == 'words'
    po = 0
    for k, idx in enumerate(_lyndon_local_indices(channels, depth)):
        i = 0
        while i < len(idx):
            j = i
            while j + 1 < len(idx) and idx[j + 1] == idx[j] + 1:
                j += 1
            ln = j - i + 1
            runs.append((po, k, idx[i], ln))
            po += ln
            i = j + 1
    return tuple(runs), po


# --------------------------------------------------------------------------- #
# Pallas kernel
# --------------------------------------------------------------------------- #
def _make_logsig_kernel(channels, depth, runs, sizes, offs8):
    def kernel(sig_ref, out_ref):
        lanes = sig_ref.shape[-1]                                 # static tile width
        # per-level blocks; accumulate the alternating series in float32
        x = [sig_ref[offs8[k]:offs8[k] + sizes[k], :].astype(jnp.float32)
             for k in range(depth)]                               # (C^k, lanes)

        acc = list(x)          # log(1+x): power 1 has coefficient +1
        Q = list(x)            # scaled previous power: coeff_{n-1} * x^{⊗(n-1)}
        prev_coeff = 1.0

        for n in range(2, depth + 1):
            coeff = ((-1.0) ** (n + 1)) / n
            ratio = coeff / prev_coeff
            prev_coeff = coeff
            # fold the series coefficient into the *smaller* operand once per level
            Qs = [None] * depth
            for i in range(n - 1, depth):
                Qs[i - 1] = ratio * Q[i - 1]
            newQ = [None] * depth
            for m in range(n, depth + 1):
                s = None
                # level m of coeff_n x^{⊗n} = sum_{i+j=m} (coeff_n x^{⊗(n-1)})_i ⊗ x_j
                for i in range(n - 1, m):
                    j = m - i
                    a = Qs[i - 1]                                  # (C^i, lanes)
                    b = x[j - 1]                                   # (C^j, lanes)
                    prod = (a[:, None, :] * b[None, :, :]).reshape(
                        channels ** m, lanes)
                    s = prod if s is None else s + prod
                newQ[m - 1] = s
                acc[m - 1] = acc[m - 1] + s
            Q = newQ

        # epilogue: emit only the requested rows (Lyndon gather fused for 'words')
        for (po, k, lo, ln) in runs:
            out_ref[po:po + ln, :] = acc[k][lo:lo + ln, :].astype(out_ref.dtype)

    return kernel


def _estimate_vmem_bytes(channels, depth, sc8, out_rows, tile, itemsize):
    est = 2 * sc8 * tile * itemsize               # double-buffered input block
    est += 2 * out_rows * tile * itemsize         # double-buffered output block
    est += 3 * sc8 * tile * 4                     # acc + Q + newQ (float32)
    est += 2 * (channels ** depth) * tile * 4     # largest product temporaries
    return est


def _choose_tile(n, channels, depth, sc8, out_rows, itemsize):
    n128 = _round_up(max(n, 1), _LANE)
    for tile in (1024, 512, 256, 128):
        if tile <= n128 and _estimate_vmem_bytes(
                channels, depth, sc8, out_rows, tile, itemsize) <= _VMEM_BUDGET:
            return tile
    return _LANE


# --------------------------------------------------------------------------- #
# cached jitted entry point (the "lyndon info" cache analogue)
# --------------------------------------------------------------------------- #
@functools.lru_cache(maxsize=None)
def _get_logsig_fn(channels, depth, mode, scalar_term):
    runs, out_rows = _output_runs(channels, depth, mode)
    sizes, sizes8, offs8 = _padded_layout(channels, depth)
    _, offs = _level_sizes_offsets(channels, depth)
    sc, sc8 = offs[-1], offs8[-1]
    kernel = _make_logsig_kernel(channels, depth, runs, sizes, offs8)

    @jax.jit
    def fn(signature):
        sig = signature[..., 1:] if scalar_term else signature
        if sig.shape[-1] != sc:
            raise ValueError("signature has the wrong number of channels")
        lead = sig.shape[:-1]                     # (batch,) or (batch, stream)
        flat = sig.reshape(-1, sc)                # stream steps are independent
        n = flat.shape[0]
        itemsize = jnp.dtype(flat.dtype).itemsize
        tile = _choose_tile(n, channels, depth, sc8, out_rows, itemsize)
        n_pad = _round_up(max(n, 1), tile)

        # (channels, batch) layout, each level start padded to an 8-row multiple
        xt = flat.T                               # (sc, n)
        blocks = []
        for k in range(depth):
            blk = xt[offs[k]:offs[k] + sizes[k], :]
            blocks.append(jnp.pad(
                blk, ((0, sizes8[k] - sizes[k]), (0, n_pad - n))))
        x = jnp.concatenate(blocks, axis=0)       # (sc8, n_pad)

        out = pl.pallas_call(
            kernel,
            out_shape=jax.ShapeDtypeStruct((out_rows, n_pad), flat.dtype),
            grid=(n_pad // tile,),
            in_specs=[pl.BlockSpec((sc8, tile), lambda i: (0, i))],
            out_specs=pl.BlockSpec((out_rows, tile), lambda i: (0, i)),
            compiler_params=pltpu.CompilerParams(
                dimension_semantics=("parallel",),
                vmem_limit_bytes=_VMEM_LIMIT),
        )(x)
        return out[:, :n].T.reshape(lead + (out_rows,))

    return fn


# --------------------------------------------------------------------------- #
# functional + module-style wrappers (mirrors signatory semantics)
# --------------------------------------------------------------------------- #
def signature_to_logsignature(signature, channels, depth, stream=False,
                              mode="words", scalar_term=False):
    if mode not in ("expand", "words", "brackets"):
        raise ValueError("Invalid values for argument 'mode'. Valid values are "
                         "'expand', 'brackets', or 'words'.")
    if mode == "brackets":
        # TODO(synk): 'brackets' mode needs the triangular Lyndon-bracket change of basis; not implemented.
        raise NotImplementedError("mode='brackets' is not implemented")
    fn = _get_logsig_fn(channels, depth, mode, bool(scalar_term))
    return fn(signature)


class SignatureToLogSignature:
    """JAX/Pallas port of signatory.SignatureToLogSignature (forward pass only)."""

    def __init__(self, channels: int, depth: int, stream: bool = False,
                 mode: str = "words", scalar_term: bool = False):
        if mode not in ("expand", "words", "brackets"):
            raise ValueError("Invalid values for argument 'mode'. Valid values "
                             "are 'expand', 'brackets', or 'words'.")
        self._channels = channels
        self._depth = depth
        self._stream = stream
        self._mode = mode
        self._scalar_term = scalar_term
        # build + cache the compiled transform now (lyndon-info cache analogue)
        if mode != "brackets":
            self._fn = _get_logsig_fn(channels, depth, mode, bool(scalar_term))
        else:
            self._fn = None

    def __call__(self, signature: jnp.ndarray) -> jnp.ndarray:
        if self._fn is None:
            raise NotImplementedError("mode='brackets' is not implemented")
        return self._fn(signature)

    def extra_repr(self):
        return "channels={}, depth={}, stream={}, mode={!r}".format(
            self._channels, self._depth, self._stream, self._mode)


# --------------------------------------------------------------------------- #
# pure-JAX reference (batch-first layout) for correctness checks
# --------------------------------------------------------------------------- #
def _logsig_expand_ref(sig_flat, channels, depth):
    sizes, offs = _level_sizes_offsets(channels, depth)
    x = [sig_flat[:, offs[k]:offs[k + 1]] for k in range(depth)]
    acc = [xi for xi in x]
    Pk = list(x)
    for n in range(2, depth + 1):
        coeff = ((-1.0) ** (n + 1)) / n
        newP = [None] * depth
        for m in range(n, depth + 1):
            s = None
            for i in range(n - 1, m):
                j = m - i
                a, b = Pk[i - 1], x[j - 1]
                prod = (a[:, :, None] * b[:, None, :]).reshape(a.shape[0], -1)
                s = prod if s is None else s + prod
            newP[m - 1] = s
            acc[m - 1] = acc[m - 1] + coeff * s
        Pk = newP
    return jnp.concatenate(acc, axis=-1)


# --------------------------------------------------------------------------- #
if __name__ == "__main__":
    channels, depth, batch = 8, 3, 2          # sig_channels = 8 + 64 + 512 = 584
    sc = signature_channels(channels, depth)
    lyndon_idx = jnp.asarray(_lyndon_word_indices(channels, depth))

    key = jax.random.PRNGKey(0)
    signature = 0.1 * jax.random.normal(key, (batch, sc), dtype=jnp.float32)

    module = SignatureToLogSignature(channels, depth, stream=False, mode="words")
    logsig = jax.block_until_ready(module(signature))

    ref = jnp.take(_logsig_expand_ref(signature, channels, depth), lyndon_idx, axis=-1)
    assert logsig.shape == (batch, logsignature_channels(channels, depth))
    assert jnp.allclose(logsig, ref, atol=1e-5, rtol=1e-5)

    # stream=True path, expanded mode (independent per-step transform)
    k2 = jax.random.PRNGKey(1)
    sig_stream = 0.1 * jax.random.normal(k2, (2, 3, sc), dtype=jnp.float32)
    mod_stream = SignatureToLogSignature(channels, depth, stream=True, mode="expand")
    out_stream = jax.block_until_ready(mod_stream(sig_stream))
    ref_stream = _logsig_expand_ref(sig_stream.reshape(-1, sc), channels, depth
                                    ).reshape(2, 3, sc)
    assert jnp.allclose(out_stream, ref_stream, atol=1e-5, rtol=1e-5)

    # larger batch: exercises the wider lane tile + multi-step grid
    k3 = jax.random.PRNGKey(2)
    sig_big = 0.1 * jax.random.normal(k3, (260, sc), dtype=jnp.float32)
    out_big = jax.block_until_ready(module(sig_big))
    ref_big = jnp.take(_logsig_expand_ref(sig_big, channels, depth), lyndon_idx, axis=-1)
    assert jnp.allclose(out_big, ref_big, atol=1e-5, rtol=1e-5)

    print("KERNEL_OK")
</pallas_src>

<mosaic_0001>
module attributes {stable_mosaic.version = 11 : i64} {
  func.func @kernel(%arg0: i32, %arg1: memref<584x128xf32, #tpu.memory_space<vmem>>, %arg2: memref<204x128xf32, #tpu.memory_space<vmem>>) attributes {dimension_semantics = [#tpu.dimension_semantics<parallel>], iteration_bounds = array<i64: 1>, scalar_prefetch = 0 : i64, scratch_operands = 0 : i64, tpu.core_type = #tpu.core_type<tc>, window_params = [{transform_indices = @transform_0, window_bounds = array<i64: 584, 128>}, {transform_indices = @transform_1, window_bounds = array<i64: 204, 128>}]} {
    %c0 = arith.constant 0 : index
    %c0_0 = arith.constant 0 : index
    %0 = vector.load %arg1[%c0, %c0_0] : memref<584x128xf32, #tpu.memory_space<vmem>>, vector<8x128xf32>
    %c8 = arith.constant 8 : index
    %c0_1 = arith.constant 0 : index
    %1 = vector.load %arg1[%c8, %c0_1] : memref<584x128xf32, #tpu.memory_space<vmem>>, vector<64x128xf32>
    %c72 = arith.constant 72 : index
    %c0_2 = arith.constant 0 : index
    %2 = vector.load %arg1[%c72, %c0_2] : memref<584x128xf32, #tpu.memory_space<vmem>>, vector<512x128xf32>
    %cst = arith.constant -5.000000e-01 : f32
    %3 = vector.broadcast %cst : f32 to vector<8x128xf32>
    %4 = arith.mulf %3, %0 : vector<8x128xf32>
    %cst_3 = arith.constant -5.000000e-01 : f32
    %5 = vector.broadcast %cst_3 : f32 to vector<64x128xf32>
    %6 = arith.mulf %5, %1 : vector<64x128xf32>
    %7 = vector.shape_cast %4 : vector<8x128xf32> to vector<8x1x128xf32>
    %8 = vector.shape_cast %0 : vector<8x128xf32> to vector<1x8x128xf32>
    %9 = vector.broadcast %7 : vector<8x1x128xf32> to vector<8x8x128xf32>
    %10 = vector.broadcast %8 : vector<1x8x128xf32> to vector<8x8x128xf32>
    %11 = arith.mulf %9, %10 : vector<8x8x128xf32>
    %12 = vector.shape_cast %11 : vector<8x8x128xf32> to vector<64x128xf32>
    %13 = arith.addf %1, %12 : vector<64x128xf32>
    %14 = vector.shape_cast %4 : vector<8x128xf32> to vector<8x1x128xf32>
    %15 = vector.shape_cast %1 : vector<64x128xf32> to vector<1x64x128xf32>
    %16 = vector.broadcast %14 : vector<8x1x128xf32> to vector<8x64x128xf32>
    %17 = vector.broadcast %15 : vector<1x64x128xf32> to vector<8x64x128xf32>
    %18 = arith.mulf %16, %17 : vector<8x64x128xf32>
    %19 = vector.shape_cast %18 : vector<8x64x128xf32> to vector<512x128xf32>
    %20 = vector.shape_cast %6 : vector<64x128xf32> to vector<64x1x128xf32>
    %21 = vector.shape_cast %0 : vector<8x128xf32> to vector<1x8x128xf32>
    %22 = vector.broadcast %20 : vector<64x1x128xf32> to vector<64x8x128xf32>
    %23 = vector.broadcast %21 : vector<1x8x128xf32> to vector<64x8x128xf32>
    %24 = arith.mulf %22, %23 : vector<64x8x128xf32>
    %25 = vector.shape_cast %24 : vector<64x8x128xf32> to vector<512x128xf32>
    %26 = arith.addf %19, %25 : vector<512x128xf32>
    %27 = arith.addf %2, %26 : vector<512x128xf32>
    %cst_4 = arith.constant -0.666666686 : f32
    %28 = vector.broadcast %cst_4 : f32 to vector<64x128xf32>
    %29 = arith.mulf %28, %12 : vector<64x128xf32>
    %30 = vector.shape_cast %29 : vector<64x128xf32> to vector<64x1x128xf32>
    %31 = vector.shape_cast %0 : vector<8x128xf32> to vector<1x8x128xf32>
    %32 = vector.broadcast %30 : vector<64x1x128xf32> to vector<64x8x128xf32>
    %33 = vector.broadcast %31 : vector<1x8x128xf32> to vector<64x8x128xf32>
    %34 = arith.mulf %32, %33 : vector<64x8x128xf32>
    %35 = vector.shape_cast %34 : vector<64x8x128xf32> to vector<512x128xf32>
    %36 = arith.addf %27, %35 : vector<512x128xf32>
    %c0_5 = arith.constant 0 : index
    %c0_6 = arith.constant 0 : index
    %37 = vector.load %arg2[%c0_5, %c0_6] : memref<204x128xf32, #tpu.memory_space<vmem>>, vector<8x128xf32>
    tpu.vector_store %arg2[%c0_5, %c0_6], %0 {strides = array<i32>} : memref<204x128xf32, #tpu.memory_space<vmem>>, vector<8x128xf32>,
    %38 = vector.extract_strided_slice %13 {offsets = [1, 0], sizes = [7, 128], strides = [1, 1]} : vector<64x128xf32> to vector<7x128xf32>
    %c8_7 = arith.constant 8 : index
    %c0_8 = arith.constant 0 : index
    %39 = vector.load %arg2[%c8_7, %c0_8] : memref<204x128xf32, #tpu.memory_space<vmem>>, vector<7x128xf32>
    tpu.vector_store %arg2[%c8_7, %c0_8], %38 {strides = array<i32>} : memref<204x128xf32, #tpu.memory_space<vmem>>, vector<7x128xf32>,
    %40 = vector.extract_strided_slice %13 {offsets = [10, 0], sizes = [6, 128], strides = [1, 1]} : vector<64x128xf32> to vector<6x128xf32>
    %c15 = arith.constant 15 : index
    %c0_9 = arith.constant 0 : index
    %41 = vector.load %arg2[%c15, %c0_9] : memref<204x128xf32, #tpu.memory_space<vmem>>, vector<6x128xf32>
    tpu.vector_store %arg2[%c15, %c0_9], %40 {strides = array<i32>} : memref<204x128xf32, #tpu.memory_space<vmem>>, vector<6x128xf32>,
    %42 = vector.extract_strided_slice %13 {offsets = [19, 0], sizes = [5, 128], strides = [1, 1]} : vector<64x128xf32> to vector<5x128xf32>
    %c21 = arith.constant 21 : index
    %c0_10 = arith.constant 0 : index
    %43 = vector.load %arg2[%c21, %c0_10] : memref<204x128xf32, #tpu.memory_space<vmem>>, vector<5x128xf32>
    tpu.vector_store %arg2[%c21, %c0_10], %42 {strides = array<i32>} : memref<204x128xf32, #tpu.memory_space<vmem>>, vector<5x128xf32>,
    %44 = vector.extract_strided_slice %13 {offsets = [28, 0], sizes = [4, 128], strides = [1, 1]} : vector<64x128xf32> to vector<4x128xf32>
    %c26 = arith.constant 26 : index
    %c0_11 = arith.constant 0 : index
    %45 = vector.load %arg2[%c26, %c0_11] : memref<204x128xf32, #tpu.memory_space<vmem>>, vector<4x128xf32>
    tpu.vector_store %arg2[%c26, %c0_11], %44 {strides = array<i32>} : memref<204x128xf32, #tpu.memory_space<vmem>>, vector<4x128xf32>,
    %46 = vector.extract_strided_slice %13 {offsets = [37, 0], sizes = [3, 128], strides = [1, 1]} : vector<64x128xf32> to vector<3x128xf32>
    %c30 = arith.constant 30 : index
    %c0_12 = arith.constant 0 : index
    %47 = vector.load %arg2[%c30, %c0_12] : memref<204x128xf32, #tpu.memory_space<vmem>>, vector<3x128xf32>
    tpu.vector_store %arg2[%c30, %c0_12], %46 {strides = array<i32>} : memref<204x128xf32, #tpu.memory_space<vmem>>, vector<3x128xf32>,
    %48 = vector.extract_strided_slice %13 {offsets = [46, 0], sizes = [2, 128], strides = [1, 1]} : vector<64x128xf32> to vector<2x128xf32>
    %c33 = arith.constant 33 : index
    %c0_13 = arith.constant 0 : index
    %49 = vector.load %arg2[%c33, %c0_13] : memref<204x128xf32, #tpu.memory_space<vmem>>, vector<2x128xf32>
    tpu.vector_store %arg2[%c33, %c0_13], %48 {strides = array<i32>} : memref<204x128xf32, #tpu.memory_space<vmem>>, vector<2x128xf32>,
    %50 = vector.extract_strided_slice %13 {offsets = [55, 0], sizes = [1, 128], strides = [1, 1]} : vector<64x128xf32> to vector<1x128xf32>
    %c35 = arith.constant 35 : index
    %c0_14 = arith.constant 0 : index
    %51 = vector.load %arg2[%c35, %c0_14] : memref<204x128xf32, #tpu.memory_space<vmem>>, vector<1x128xf32>
    tpu.vector_store %arg2[%c35, %c0_14], %50 {strides = array<i32>} : memref<204x128xf32, #tpu.memory_space<vmem>>, vector<1x128xf32>,
    %52 = vector.extract_strided_slice %36 {offsets = [1, 0], sizes = [7, 128], strides = [1, 1]} : vector<512x128xf32> to vector<7x128xf32>
    %c36 = arith.constant 36 : index
    %c0_15 = arith.constant 0 : index
    %53 = vector.load %arg2[%c36, %c0_15] : memref<204x128xf32, #tpu.memory_space<vmem>>, vector<7x128xf32>
    tpu.vector_store %arg2[%c36, %c0_15], %52 {strides = array<i32>} : memref<204x128xf32, #tpu.memory_space<vmem>>, vector<7x128xf32>,
    %54 = vector.extract_strided_slice %36 {offsets = [9, 0], sizes = [7, 128], strides = [1, 1]} : vector<512x128xf32> to vector<7x128xf32>
    %c43 = arith.constant 43 : index
    %c0_16 = arith.constant 0 : index
    %55 = vector.load %arg2[%c43, %c0_16] : memref<204x128xf32, #tpu.memory_space<vmem>>, vector<7x128xf32>
    tpu.vector_store %arg2[%c43, %c0_16], %54 {strides = array<i32>} : memref<204x128xf32, #tpu.memory_space<vmem>>, vector<7x128xf32>,
    %56 = vector.extract_strided_slice %36 {offsets = [17, 0], sizes = [7, 128], strides = [1, 1]} : vector<512x128xf32> to vector<7x128xf32>
    %c50 = arith.constant 50 : index
    %c0_17 = arith.constant 0 : index
    %57 = vector.load %arg2[%c50, %c0_17] : memref<204x128xf32, #tpu.memory_space<vmem>>, vector<7x128xf32>
    tpu.vector_store %arg2[%c50, %c0_17], %56 {strides = array<i32>} : memref<204x128xf32, #tpu.memory_space<vmem>>, vector<7x128xf32>,
    %58 = vector.extract_strided_slice %36 {offsets = [25, 0], sizes = [7, 128], strides = [1, 1]} : vector<512x128xf32> to vector<7x128xf32>
    %c57 = arith.constant 57 : index
    %c0_18 = arith.constant 0 : index
    %59 = vector.load %arg2[%c57, %c0_18] : memref<204x128xf32, #tpu.memory_space<vmem>>, vector<7x128xf32>
    tpu.vector_store %arg2[%c57, %c0_18], %58 {strides = array<i32>} : memref<204x128xf32, #tpu.memory_space<vmem>>, vector<7x128xf32>,
    %60 = vector.extract_strided_slice %36 {offsets = [33, 0], sizes = [7, 128], strides = [1, 1]} : vector<512x128xf32> to vector<7x128xf32>
    %c64 = arith.constant 64 : index
    %c0_19 = arith.constant 0 : index
    %61 = vector.load %arg2[%c64, %c0_19] : memref<204x128xf32, #tpu.memory_space<vmem>>, vector<7x128xf32>
    tpu.vector_store %arg2[%c64, %c0_19], %60 {strides = array<i32>} : memref<204x128xf32, #tpu.memory_space<vmem>>, vector<7x128xf32>,
    %62 = vector.extract_strided_slice %36 {offsets = [41, 0], sizes = [7, 128], strides = [1, 1]} : vector<512x128xf32> to vector<7x128xf32>
    %c71 = arith.constant 71 : index
    %c0_20 = arith.constant 0 : index
    %63 = vector.load %arg2[%c71, %c0_20] : memref<204x128xf32, #tpu.memory_space<vmem>>, vector<7x128xf32>
    tpu.vector_store %arg2[%c71, %c0_20], %62 {strides = array<i32>} : memref<204x128xf32, #tpu.memory_space<vmem>>, vector<7x128xf32>,
    %64 = vector.extract_strided_slice %36 {offsets = [49, 0], sizes = [7, 128], strides = [1, 1]} : vector<512x128xf32> to vector<7x128xf32>
    %c78 = arith.constant 78 : index
    %c0_21 = arith.constant 0 : index
    %65 = vector.load %arg2[%c78, %c0_21] : memref<204x128xf32, #tpu.memory_space<vmem>>, vector<7x128xf32>
    tpu.vector_store %arg2[%c78, %c0_21], %64 {strides = array<i32>} : memref<204x128xf32, #tpu.memory_space<vmem>>, vector<7x128xf32>,
    %66 = vector.extract_strided_slice %36 {offsets = [57, 0], sizes = [7, 128], strides = [1, 1]} : vector<512x128xf32> to vector<7x128xf32>
    %c85 = arith.constant 85 : index
    %c0_22 = arith.constant 0 : index
    %67 = vector.load %arg2[%c85, %c0_22] : memref<204x128xf32, #tpu.memory_space<vmem>>, vector<7x128xf32>
    tpu.vector_store %arg2[%c85, %c0_22], %66 {strides = array<i32>} : memref<204x128xf32, #tpu.memory_space<vmem>>, vector<7x128xf32>,
    %68 = vector.extract_strided_slice %36 {offsets = [74, 0], sizes = [6, 128], strides = [1, 1]} : vector<512x128xf32> to vector<6x128xf32>
    %c92 = arith.constant 92 : index
    %c0_23 = arith.constant 0 : index
    %69 = vector.load %arg2[%c92, %c0_23] : memref<204x128xf32, #tpu.memory_space<vmem>>, vector<6x128xf32>
    tpu.vector_store %arg2[%c92, %c0_23], %68 {strides = array<i32>} : memref<204x128xf32, #tpu.memory_space<vmem>>, vector<6x128xf32>,
    %70 = vector.extract_strided_slice %36 {offsets = [82, 0], sizes = [6, 128], strides = [1, 1]} : vector<512x128xf32> to vector<6x128xf32>
    %c98 = arith.constant 98 : index
    %c0_24 = arith.constant 0 : index
    %71 = vector.load %arg2[%c98, %c0_24] : memref<204x128xf32, #tpu.memory_space<vmem>>, vector<6x128xf32>
    tpu.vector_store %arg2[%c98, %c0_24], %70 {strides = array<i32>} : memref<204x128xf32, #tpu.memory_space<vmem>>, vector<6x128xf32>,
    %72 = vector.extract_strided_slice %36 {offsets = [90, 0], sizes = [6, 128], strides = [1, 1]} : vector<512x128xf32> to vector<6x128xf32>
    %c104 = arith.constant 104 : index
    %c0_25 = arith.constant 0 : index
    %73 = vector.load %arg2[%c104, %c0_25] : memref<204x128xf32, #tpu.memory_space<vmem>>, vector<6x128xf32>
    tpu.vector_store %arg2[%c104, %c0_25], %72 {strides = array<i32>} : memref<204x128xf32, #tpu.memory_space<vmem>>, vector<6x128xf32>,
    %74 = vector.extract_strided_slice %36 {offsets = [98, 0], sizes = [6, 128], strides = [1, 1]} : vector<512x128xf32> to vector<6x128xf32>
    %c110 = arith.constant 110 : index
    %c0_26 = arith.constant 0 : index
    %75 = vector.load %arg2[%c110, %c0_26] : memref<204x128xf32, #tpu.memory_space<vmem>>, vector<6x128xf32>
    tpu.vector_store %arg2[%c110, %c0_26], %74 {strides = array<i32>} : memref<204x128xf32, #tpu.memory_space<vmem>>, vector<6x128xf32>,
    %76 = vector.extract_strided_slice %36 {offsets = [106, 0], sizes = [6, 128], strides = [1, 1]} : vector<512x128xf32> to vector<6x128xf32>
    %c116 = arith.constant 116 : index
    %c0_27 = arith.constant 0 : index
    %77 = vector.load %arg2[%c116, %c0_27] : memref<204x128xf32, #tpu.memory_space<vmem>>, vector<6x128xf32>
    tpu.vector_store %arg2[%c116, %c0_27], %76 {strides = array<i32>} : memref<204x128xf32, #tpu.memory_space<vmem>>, vector<6x128xf32>,
    %78 = vector.extract_strided_slice %36 {offsets = [114, 0], sizes = [6, 128], strides = [1, 1]} : vector<512x128xf32> to vector<6x128xf32>
    %c122 = arith.constant 122 : index
    %c0_28 = arith.constant 0 : index
    %79 = vector.load %arg2[%c122, %c0_28] : memref<204x128xf32, #tpu.memory_space<vmem>>, vector<6x128xf32>
    tpu.vector_store %arg2[%c122, %c0_28], %78 {strides = array<i32>} : memref<204x128xf32, #tpu.memory_space<vmem>>, vector<6x128xf32>,
    %80 = vector.extract_strided_slice %36 {offsets = [122, 0], sizes = [6, 128], strides = [1, 1]} : vector<512x128xf32> to vector<6x128xf32>
    %c128 = arith.constant 128 : index
    %c0_29 = arith.constant 0 : index
    %81 = vector.load %arg2[%c128, %c0_29] : memref<204x128xf32, #tpu.memory_space<vmem>>, vector<6x128xf32>
    tpu.vector_store %arg2[%c128, %c0_29], %80 {strides = array<i32>} : memref<204x128xf32, #tpu.memory_space<vmem>>, vector<6x128xf32>,
    %82 = vector.extract_strided_slice %36 {offsets = [147, 0], sizes = [5, 128], strides = [1, 1]} : vector<512x128xf32> to vector<5x128xf32>
    %c134 = arith.constant 134 : index
    %c0_30 = arith.constant 0 : index
    %83 = vector.load %arg2[%c134, %c0_30] : memref<204x128xf32, #tpu.memory_space<vmem>>, vector<5x128xf32>
    tpu.vector_store %arg2[%c134, %c0_30], %82 {strides = array<i32>} : memref<204x128xf32, #tpu.memory_space<vmem>>, vector<5x128xf32>,
    %84 = vector.extract_strided_slice %36 {offsets = [155, 0], sizes = [5, 128], strides = [1, 1]} : vector<512x128xf32> to vector<5x128xf32>
    %c139 = arith.constant 139 : index
    %c0_31 = arith.constant 0 : index
    %85 = vector.load %arg2[%c139, %c0_31] : memref<204x128xf32, #tpu.memory_space<vmem>>, vector<5x128xf32>
    tpu.vector_store %arg2[%c139, %c0_31], %84 {strides = array<i32>} : memref<204x128xf32, #tpu.memory_space<vmem>>, vector<5x128xf32>,
    %86 = vector.extract_strided_slice %36 {offsets = [163, 0], sizes = [5, 128], strides = [1, 1]} : vector<512x128xf32> to vector<5x128xf32>
    %c144 = arith.constant 144 : index
    %c0_32 = arith.constant 0 : index
    %87 = vector.load %arg2[%c144, %c0_32] : memref<204x128xf32, #tpu.memory_space<vmem>>, vector<5x128xf32>
    tpu.vector_store %arg2[%c144, %c0_32], %86 {strides = array<i32>} : memref<204x128xf32, #tpu.memory_space<vmem>>, vector<5x128xf32>,
    %88 = vector.extract_strided_slice %36 {offsets = [171, 0], sizes = [5, 128], strides = [1, 1]} : vector<512x128xf32> to vector<5x128xf32>
    %c149 = arith.constant 149 : index
    %c0_33 = arith.constant 0 : index
    %89 = vector.load %arg2[%c149, %c0_33] : memref<204x128xf32, #tpu.memory_space<vmem>>, vector<5x128xf32>
    tpu.vector_store %arg2[%c149, %c0_33], %88 {strides = array<i32>} : memref<204x128xf32, #tpu.memory_space<vmem>>, vector<5x128xf32>,
    %90 = vector.extract_strided_slice %36 {offsets = [179, 0], sizes = [5, 128], strides = [1, 1]} : vector<512x128xf32> to vector<5x128xf32>
    %c154 = arith.constant 154 : index
    %c0_34 = arith.constant 0 : index
    %91 = vector.load %arg2[%c154, %c0_34] : memref<204x128xf32, #tpu.memory_space<vmem>>, vector<5x128xf32>
    tpu.vector_store %arg2[%c154, %c0_34], %90 {strides = array<i32>} : memref<204x128xf32, #tpu.memory_space<vmem>>, vector<5x128xf32>,
    %92 = vector.extract_strided_slice %36 {offsets = [187, 0], sizes = [5, 128], strides = [1, 1]} : vector<512x128xf32> to vector<5x128xf32>
    %c159 = arith.constant 159 : index
    %c0_35 = arith.constant 0 : index
    %93 = vector.load %arg2[%c159, %c0_35] : memref<204x128xf32, #tpu.memory_space<vmem>>, vector<5x128xf32>
    tpu.vector_store %arg2[%c159, %c0_35], %92 {strides = array<i32>} : memref<204x128xf32, #tpu.memory_space<vmem>>, vector<5x128xf32>,
    %94 = vector.extract_strided_slice %36 {offsets = [220, 0], sizes = [4, 128], strides = [1, 1]} : vector<512x128xf32> to vector<4x128xf32>
    %c164 = arith.constant 164 : index
    %c0_36 = arith.constant 0 : index
    %95 = vector.load %arg2[%c164, %c0_36] : memref<204x128xf32, #tpu.memory_space<vmem>>, vector<4x128xf32>
    tpu.vector_store %arg2[%c164, %c0_36], %94 {strides = array<i32>} : memref<204x128xf32, #tpu.memory_space<vmem>>, vector<4x128xf32>,
    %96 = vector.extract_strided_slice %36 {offsets = [228, 0], sizes = [4, 128], strides = [1, 1]} : vector<512x128xf32> to vector<4x128xf32>
    %c168 = arith.constant 168 : index
    %c0_37 = arith.constant 0 : index
    %97 = vector.load %arg2[%c168, %c0_37] : memref<204x128xf32, #tpu.memory_space<vmem>>, vector<4x128xf32>
    tpu.vector_store %arg2[%c168, %c0_37], %96 {strides = array<i32>} : memref<204x128xf32, #tpu.memory_space<vmem>>, vector<4x128xf32>,
    %98 = vector.extract_strided_slice %36 {offsets = [236, 0], sizes = [4, 128], strides = [1, 1]} : vector<512x128xf32> to vector<4x128xf32>
    %c172 = arith.constant 172 : index
    %c0_38 = arith.constant 0 : index
    %99 = vector.load %arg2[%c172, %c0_38] : memref<204x128xf32, #tpu.memory_space<vmem>>, vector<4x128xf32>
    tpu.vector_store %arg2[%c172, %c0_38], %98 {strides = array<i32>} : memref<204x128xf32, #tpu.memory_space<vmem>>, vector<4x128xf32>,
    %100 = vector.extract_strided_slice %36 {offsets = [244, 0], sizes = [4, 128], strides = [1, 1]} : vector<512x128xf32> to vector<4x128xf32>
    %c176 = arith.constant 176 : index
    %c0_39 = arith.constant 0 : index
    %101 = vector.load %arg2[%c176, %c0_39] : memref<204x128xf32, #tpu.memory_space<vmem>>, vector<4x128xf32>
    tpu.vector_store %arg2[%c176, %c0_39], %100 {strides = array<i32>} : memref<204x128xf32, #tpu.memory_space<vmem>>, vector<4x128xf32>,
    %102 = vector.extract_strided_slice %36 {offsets = [252, 0], sizes = [4, 128], strides = [1, 1]} : vector<512x128xf32> to vector<4x128xf32>
    %c180 = arith.constant 180 : index
    %c0_40 = arith.constant 0 : index
    %103 = vector.load %arg2[%c180, %c0_40] : memref<204x128xf32, #tpu.memory_space<vmem>>, vector<4x128xf32>
    tpu.vector_store %arg2[%c180, %c0_40], %102 {strides = array<i32>} : memref<204x128xf32, #tpu.memory_space<vmem>>, vector<4x128xf32>,
    %104 = vector.extract_strided_slice %36 {offsets = [293, 0], sizes = [3, 128], strides = [1, 1]} : vector<512x128xf32> to vector<3x128xf32>
    %c184 = arith.constant 184 : index
    %c0_41 = arith.constant 0 : index
    %105 = vector.load %arg2[%c184, %c0_41] : memref<204x128xf32, #tpu.memory_space<vmem>>, vector<3x128xf32>
    tpu.vector_store %arg2[%c184, %c0_41], %104 {strides = array<i32>} : memref<204x128xf32, #tpu.memory_space<vmem>>, vector<3x128xf32>,
    %106 = vector.extract_strided_slice %36 {offsets = [301, 0], sizes = [3, 128], strides = [1, 1]} : vector<512x128xf32> to vector<3x128xf32>
    %c187 = arith.constant 187 : index
    %c0_42 = arith.constant 0 : index
    %107 = vector.load %arg2[%c187, %c0_42] : memref<204x128xf32, #tpu.memory_space<vmem>>, vector<3x128xf32>
    tpu.vector_store %arg2[%c187, %c0_42], %106 {strides = array<i32>} : memref<204x128xf32, #tpu.memory_space<vmem>>, vector<3x128xf32>,
    %108 = vector.extract_strided_slice %36 {offsets = [309, 0], sizes = [3, 128], strides = [1, 1]} : vector<512x128xf32> to vector<3x128xf32>
    %c190 = arith.constant 190 : index
    %c0_43 = arith.constant 0 : index
    %109 = vector.load %arg2[%c190, %c0_43] : memref<204x128xf32, #tpu.memory_space<vmem>>, vector<3x128xf32>
    tpu.vector_store %arg2[%c190, %c0_43], %108 {strides = array<i32>} : memref<204x128xf32, #tpu.memory_space<vmem>>, vector<3x128xf32>,
    %110 = vector.extract_strided_slice %36 {offsets = [317, 0], sizes = [3, 128], strides = [1, 1]} : vector<512x128xf32> to vector<3x128xf32>
    %c193 = arith.constant 193 : index
    %c0_44 = arith.constant 0 : index
    %111 = vector.load %arg2[%c193, %c0_44] : memref<204x128xf32, #tpu.memory_space<vmem>>, vector<3x128xf32>
    tpu.vector_store %arg2[%c193, %c0_44], %110 {strides = array<i32>} : memref<204x128xf32, #tpu.memory_space<vmem>>, vector<3x128xf32>,
    %112 = vector.extract_strided_slice %36 {offsets = [366, 0], sizes = [2, 128], strides = [1, 1]} : vector<512x128xf32> to vector<2x128xf32>
    %c196 = arith.constant 196 : index
    %c0_45 = arith.constant 0 : index
    %113 = vector.load %arg2[%c196, %c0_45] : memref<204x128xf32, #tpu.memory_space<vmem>>, vector<2x128xf32>
    tpu.vector_store %arg2[%c196, %c0_45], %112 {strides = array<i32>} : memref<204x128xf32, #tpu.memory_space<vmem>>, vector<2x128xf32>,
    %114 = vector.extract_strided_slice %36 {offsets = [374, 0], sizes = [2, 128], strides = [1, 1]} : vector<512x128xf32> to vector<2x128xf32>
    %c198 = arith.constant 198 : index
    %c0_46 = arith.constant 0 : index
    %115 = vector.load %arg2[%c198, %c0_46] : memref<204x128xf32, #tpu.memory_space<vmem>>, vector<2x128xf32>
    tpu.vector_store %arg2[%c198, %c0_46], %114 {strides = array<i32>} : memref<204x128xf32, #tpu.memory_space<vmem>>, vector<2x128xf32>,
    %116 = vector.extract_strided_slice %36 {offsets = [382, 0], sizes = [2, 128], strides = [1, 1]} : vector<512x128xf32> to vector<2x128xf32>
    %c200 = arith.constant 200 : index
    %c0_47 = arith.constant 0 : index
    %117 = vector.load %arg2[%c200, %c0_47] : memref<204x128xf32, #tpu.memory_space<vmem>>, vector<2x128xf32>
    tpu.vector_store %arg2[%c200, %c0_47], %116 {strides = array<i32>} : memref<204x128xf32, #tpu.memory_space<vmem>>, vector<2x128xf32>,
    %118 = vector.extract_strided_slice %36 {offsets = [439, 0], sizes = [1, 128], strides = [1, 1]} : vector<512x128xf32> to vector<1x128xf32>
    %c202 = arith.constant 202 : index
    %c0_48 = arith.constant 0 : index
    %119 = vector.load %arg2[%c202, %c0_48] : memref<204x128xf32, #tpu.memory_space<vmem>>, vector<1x128xf32>
    tpu.vector_store %arg2[%c202, %c0_48], %118 {strides = array<i32>} : memref<204x128xf32, #tpu.memory_space<vmem>>, vector<1x128xf32>,
    %120 = vector.extract_strided_slice %36 {offsets = [447, 0], sizes = [1, 128], strides = [1, 1]} : vector<512x128xf32> to vector<1x128xf32>
    %c203 = arith.constant 203 : index
    %c0_49 = arith.constant 0 : index
    %121 = vector.load %arg2[%c203, %c0_49] : memref<204x128xf32, #tpu.memory_space<vmem>>, vector<1x128xf32>
    tpu.vector_store %arg2[%c203, %c0_49], %120 {strides = array<i32>} : memref<204x128xf32, #tpu.memory_space<vmem>>, vector<1x128xf32>,
    return
  }
  func.func @transform_0(%arg0: i32) -> (i32, i32) {
    %c0_i32 = arith.constant 0 : i32
    %c0_i32_0 = arith.constant 0 : i32
    return %c0_i32, %arg0 : i32, i32
  }
  func.func @transform_1(%arg0: i32) -> (i32, i32) {
    %c0_i32 = arith.constant 0 : i32
    %c0_i32_0 = arith.constant 0 : i32
    return %c0_i32, %arg0 : i32, i32
  }
}

</mosaic_0001>

<bundles_post_ra>
// kernel: fn.1
= control target key start
LH: loop header
LB: loop body
LE: loop exit
PB: predicated region body
PF: predicated region fallthrough
CT: control target
= control target key end

     0   :  { %v65_v0 = vlaneseq  ;;  %v1315_v3 = vmov 1966171168   ;;  %s2082_s0 = inlined_call_operand.vmem [shape: f32[584,128], index: 0, kind: input, shape index: {}]   ;;  %s2083_s1 = inlined_call_operand.vmem [shape: f32[204,128], index: 1, kind: output, shape index: {}]  }
   0x1   :  { %v1329_v1 = vld [vmem:[%s2082_s0] sm:$0xff]  ;;  %v1334_v2 = vld [vmem:[%s2082_s0 + $0x8] sm:$0xff]  ;;  %v63_v4 = vunpack.c.l.s4 %v1315_v3  ;;  %v1339_v5 = vld [vmem:[%s2082_s0 + $0x10] sm:$0xff] }
   0x2   :  { %1265 = vst [vmem:[%s2083_s1] sm:$0xff] %v1329_v1  ;;  %v52_v6 = vmul.f32 -0.5, %v1329_v1  ;;  %v53_v7 = vmul.f32 -0.5, %v1334_v2  ;;  %v66_v8 = vshrl.u32 %v65_v0, 7  ;;  %v54_v9 = vmul.f32 -0.5, %v1339_v5  ;;  %v1351_v10 = vld [vmem:[%s2082_s0 + $0x18] sm:$0xff]  ;;  %v1356_v11 = vld [vmem:[%s2082_s0 + $0x20] sm:$0xff] }
   0x3   :  { %v64_v12 = vunpack.c.0.s8 %v63_v4  ;;  %v55_v13 = vmul.f32 -0.5, %v1351_v10  ;;  %v1362_v14 = vld [vmem:[%s2082_s0 + $0x28] sm:$0xff]  ;;  %v1365_v15 = vmul.f32 -0.5, %v1356_v11  ;;  %v1370_v19 = vld [vmem:[%s2082_s0 + $0x30] sm:$0xff]  ;;  %v1377_v21 = vld [vmem:[%s2082_s0 + $0x38] sm:$0xff] }
   0x4   :  { %v200_v16 = vcombine.high %v53_v7, %v53_v7  ;;  %v249_v17 = vcombine.high %v54_v9, %v54_v9  ;;  %v61_v18 = vcombine.high %v52_v6, %v52_v6  ;;  %v1379_v23 = vsub.s32 0, %v66_v8 }
   0x5   :  { %v1372_v20 = vsub.s32 %v64_v12, %v66_v8  ;;  %v298_v22 = vcombine.high %v55_v13, %v55_v13  ;;  %v1384_v25 = vmul.f32 -0.5, %v1362_v14  ;;  %v1392_v29 = vmul.f32 -0.5, %v1370_v19 }
   0x6   :  { %v1402_v33 = vmul.f32 -0.5, %v1377_v21 }
   0x7   :  { %v68_v26 = vrot.slane %v52_v6, %v1372_v20  ;;  %v207_v27 = vrot.slane %v53_v7, %v1372_v20  ;;  %v1389_v28 = vrot.slane %v200_v16, %v1372_v20  ;;  %v1395_v30 = vrot.slane %v54_v9, %v1372_v20 }
   0x8   :  { %v75_v31 = vrot.slane %v61_v18, %v1372_v20  ;;  %v1399_v32 = vrot.slane %v249_v17, %v1372_v20  ;;  %v1406_v36 = vrot.slane %v55_v13, %v1372_v20  ;;  %v1409_v37 = vrot.slane %v298_v22, %v1372_v20 }
   0x9   :  { %v84_v34 = vrot.slane %v68_v26, %v1372_v20  ;;  %v215_v35 = vcombine.high %v207_v27, %v207_v27  ;;  %v216_v38 = vcombine.high %v1389_v28, %v1389_v28  ;;  %v76_v39 = vcombine.high %v68_v26, %v68_v26 }
   0xa   :  { %v91_v40 = vrot.slane %v75_v31, %v1372_v20  ;;  %v77_v41 = vcombine.high %v75_v31, %v75_v31  ;;  %v1418_v43 = vrot.slane %v207_v27, %v1372_v20  ;;  %v1422_v45 = vrot.slane %v1389_v28, %v1372_v20 }
   0xb   :  { %v1415_v42 = vrot.slane %v84_v34, %v1379_v23  ;;  %v106_v44 = vcombine.high %v84_v34, %v84_v34  ;;  %v98_v46 = vrot.slane %v76_v39, %v1372_v20  ;;  %v1437_v53 = vrot.slane %v215_v35, %v1372_v20 }
   0xc   :  { %v1426_v47 = vrot.slane %v91_v40, %v1379_v23  ;;  %v105_v48 = vrot.slane %v77_v41, %v1372_v20  ;;  %v107_v49 = vcombine.high %v91_v40, %v91_v40  ;;  %v466_v52 = vrot.slane %v1418_v43, %v1379_v23 }
   0xd   :  { %v144_v50 = vmul.f32 %v1415_v42, %v1329_v1  ;;  %v1432_v51 = vrot.slane %v106_v44, %v1379_v23  ;;  %v1440_v54 = vrot.slane %v98_v46, %v1379_v23  ;;  %v108_v55 = vcombine.high %v98_v46, %v98_v46 }
   0xe   :  { %v148_v56 = vmul.f32 %v1426_v47, %v1329_v1  ;;  %v1445_v57 = vrot.slane %v105_v48, %v1379_v23  ;;  %v1453_v61 = vrot.slane %v107_v49, %v1379_v23  ;;  %v158_v4 = vmul.f32 %v1415_v42, %v1334_v2 }
   0xf   :  { %v151_v58 = vadd.f32 %v144_v50, %v1334_v2  ;;  %v1448_v59 = vmul.f32 -0.6666667, %v144_v50  ;;  %v146_v60 = vmul.f32 %v1432_v51, %v1329_v1  ;;  %v145_v62 = vmul.f32 %v1440_v54, %v1329_v1  ;;  %v17_v50 = vld [vmem:[%s2082_s0 + $0x48] sm:$0xff] }
  0x10   :  { %v1458_v63 = vrot.slane %v108_v55, %v1379_v23  ;;  %v155_v0 = vadd.f32 %v148_v56, %v1362_v14  ;;  %v747_v3 = vmul.f32 -0.6666667, %v148_v56  ;;  %v638_v8 = vmul.f32 %v466_v52, %v1329_v1 }
  0x11   :  { %1266 = vst [vmem:[%s2083_s1 + $0x7] sm:$0xfe] %v151_v58  ;;  %v153_v6 = vadd.f32 %v146_v60, %v1351_v10  ;;  %v1467_v7 = vmul.f32 -0.6666667, %v146_v60  ;;  %v757_v9 = vcombine.high %v1448_v59, %v1448_v59  ;;  %v152_v12 = vadd.f32 %v145_v62, %v1339_v5 }
  0x12   :  { %v1473_v13 = vmul.f32 -0.6666667, %v145_v62  ;;  %v147_v2 = vmul.f32 %v1458_v63, %v1329_v1  ;;  %1270 = vst [vmem:[%s2083_s1 + $0x19] sm:$0xe0] %v155_v0  ;;  %v945_v17 = vcombine.high %v747_v3, %v747_v3  ;;  %v149_v18 = vmul.f32 %v1445_v57, %v1329_v1 }
  0x13   :  { %v1482_v16 = vrot.slane %v1467_v7, %v1372_v20  ;;  %1268 = vst [vmem:[%s2083_s1 + $0x12] sm:$0xf8] %v153_v6  ;;  %v150_v22 = vmul.f32 %v1453_v61, %v1329_v1  ;;  %v764_v26 = vrot.slane %v1448_v59, %v1372_v20  ;;  %1267 = vst [vmem:[%s2083_s1 + $0xd] sm:$0xfc] %v152_v12 }
  0x14   :  { %v855_v27 = vcombine.high %v1467_v7, %v1467_v7  ;;  %v154_v31 = vadd.f32 %v147_v2, %v1356_v11  ;;  %v1499_v34 = vmul.f32 -0.6666667, %v147_v2  ;;  %v806_v35 = vcombine.high %v1473_v13, %v1473_v13 }
  0x15   :  { %v1505_v39 = vrot.slane %v1473_v13, %v1372_v20  ;;  %v156_v40 = vadd.f32 %v149_v18, %v1370_v19  ;;  %v1508_v41 = vmul.f32 -0.6666667, %v149_v18  ;;  %v870_v44 = vcombine.high %v1482_v16, %v1482_v16 }
  0x16   :  { %v1514_v46 = vrot.slane %v1499_v34, %v1372_v20  ;;  %1269 = vst [vmem:[%s2083_s1 + $0x16] sm:$0xf0] %v154_v31  ;;  %v157_v48 = vadd.f32 %v150_v22, %v1377_v21  ;;  %v1520_v49 = vmul.f32 -0.6666667, %v150_v22  ;;  %v1528_v55 = vrot.slane %v945_v17, %v1372_v20  ;;  %v18_v31 = vld [vmem:[%s2082_s0 + $0x50] sm:$0xff] }
  0x17   :  { %1271 = vst [vmem:[%s2083_s1 + $0x1b] sm:$0xc0] %v156_v40  ;;  %v673_v56 = vadd.f32 %v638_v8, %v158_v4  ;;  %v780_v58 = vrot.slane %v764_v26, %v1372_v20  ;;  %v159_v62 = vmul.f32 %v1415_v42, %v1339_v5  ;;  %v470_v0 = vrot.slane %v1437_v53, %v1379_v23 }
  0x18   :  { %1272 = vst [vmem:[%s2083_s1 + $0x1c] sm:$0x80] %v157_v48  ;;  %v772_v3 = vcombine.high %v764_v26, %v764_v26  ;;  %v160_v18 = vmul.f32 %v1415_v42, %v1351_v10  ;;  %v245_v22 = vcombine.high %v1418_v43, %v1418_v43  ;;  %v161_v48 = vmul.f32 %v1415_v42, %v1356_v11 }
  0x19   :  { %v708_v8 = vadd.f32 %v673_v56, %v17_v50  ;;  %v1023_v12 = vrot.slane %v780_v58, %v1379_v23  ;;  %v639_v2 = vmul.f32 %v470_v0, %v1329_v1  ;;  %v802_v40 = vcombine.high %v780_v58, %v780_v58 }
  0x1a   :  { %v794_v17 = vrot.slane %v772_v3, %v1372_v20  ;;  %v247_v50 = vcombine.high %v1437_v53, %v1437_v53  ;;  %v474_v3 = vrot.slane %v245_v22, %v1379_v23  ;;  %v162_v58 = vmul.f32 %v1415_v42, %v1362_v14 }
  0x1b   :  { %v1195_v26 = vmul.f32 %v1023_v12, %v1329_v1  ;;  %v674_v56 = vadd.f32 %v639_v2, %v159_v62  ;;  %v1031_v12 = vrot.slane %v802_v40, %v1379_v23  ;;  %v19_v62 = vld [vmem:[%s2082_s0 + $0x58] sm:$0xff] }
  0x1c   :  { %v1027_v0 = vrot.slane %v794_v17, %v1379_v23  ;;  %v804_v4 = vcombine.high %v794_v17, %v794_v17  ;;  %v478_v52 = vrot.slane %v247_v50, %v1379_v23  ;;  %v640_v60 = vmul.f32 %v474_v3, %v1329_v1 }
  0x1d   :  { %v1230_v43 = vadd.f32 %v1195_v26, %v708_v8  ;;  %v709_v24 = vadd.f32 %v674_v56, %v18_v31  ;;  %v1197_v8 = vmul.f32 %v1031_v12, %v1329_v1  ;;  %v482_v17 = vrot.slane %v1422_v45, %v1379_v23  ;;  %v20_v31 = vld [vmem:[%s2082_s0 + $0x60] sm:$0xff] }
  0x1e   :  { %v1196_v6 = vmul.f32 %v1027_v0, %v1329_v1  ;;  %v1035_v53 = vrot.slane %v804_v4, %v1379_v23  ;;  %v641_v2 = vmul.f32 %v478_v52, %v1329_v1  ;;  %v771_v4 = vrot.slane %v757_v9, %v1372_v20  ;;  %v21_v9 = vld [vmem:[%s2082_s0 + $0x68] sm:$0xff] }
  0x1f   :  { %1273 = vst [vmem:[%s2083_s1 + $0x23] sm:$0xfe] %v1230_v43  ;;  %v675_v26 = vadd.f32 %v640_v60, %v160_v18  ;;  %v163_v50 = vmul.f32 %v1415_v42, %v1370_v19  ;;  %v642_v56 = vmul.f32 %v482_v17, %v1329_v1  ;;  %v246_v18 = vcombine.high %v1422_v45, %v1422_v45  ;;  %v1612_v43 = vld [vmem:[%s2082_s0 + $0x40] sm:$0xff] }
  0x20   :  { %v1231_v22 = vadd.f32 %v1196_v6, %v709_v24  ;;  %v1198_v40 = vmul.f32 %v1035_v53, %v1329_v1  ;;  %v676_v52 = vadd.f32 %v641_v2, %v161_v48  ;;  %v787_v0 = vrot.slane %v771_v4, %v1372_v20 }
  0x21   :  { %v244_v24 = vrot.slane %v216_v38, %v1372_v20  ;;  %v710_v59 = vadd.f32 %v675_v26, %v19_v62  ;;  %v773_v60 = vcombine.high %v771_v4, %v771_v4  ;;  %v164_v6 = vmul.f32 %v1415_v42, %v1377_v21 }
  0x22   :  { %1274 = vst [vmem:[%s2083_s1 + $0x2a] sm:$0xfe] %v1231_v22  ;;  %v711_v48 = vadd.f32 %v676_v52, %v20_v31  ;;  %v677_v3 = vadd.f32 %v642_v56, %v162_v58  ;;  %v1039_v28 = vrot.slane %v787_v0, %v1379_v23  ;;  %v490_v62 = vrot.slane %v246_v18, %v1379_v23  ;;  %v22_v22 = vld [vmem:[%s2082_s0 + $0x70] sm:$0xff] }
  0x23   :  { %v486_v38 = vrot.slane %v244_v24, %v1379_v23  ;;  %v1232_v12 = vadd.f32 %v1197_v8, %v710_v59  ;;  %v801_v53 = vrot.slane %v773_v60, %v1372_v20  ;;  %v803_v2 = vcombine.high %v787_v0, %v787_v0  ;;  %v23_v0 = vld [vmem:[%s2082_s0 + $0x78] sm:$0xff] }
  0x24   :  { %v1233_v17 = vadd.f32 %v1198_v40, %v711_v48  ;;  %v712_v4 = vadd.f32 %v677_v3, %v21_v9  ;;  %v1199_v45 = vmul.f32 %v1039_v28, %v1329_v1  ;;  %v644_v26 = vmul.f32 %v490_v62, %v1329_v1 }
  0x25   :  { %v643_v58 = vmul.f32 %v486_v38, %v1329_v1  ;;  %1275 = vst [vmem:[%s2083_s1 + $0x31] sm:$0xfe] %v1232_v12  ;;  %v1043_v8 = vrot.slane %v801_v53, %v1379_v23  ;;  %v1047_v31 = vrot.slane %v803_v2, %v1379_v23  ;;  %v165_v40 = vmul.f32 %v1415_v42, %v1612_v43 }
  0x26   :  { %1276 = vst [vmem:[%s2083_s1 + $0x38] sm:$0xfe] %v1233_v17  ;;  %v1234_v52 = vadd.f32 %v1199_v45, %v712_v4  ;;  %v248_v59 = vcombine.high %v244_v24, %v244_v24  ;;  %v805_v9 = vcombine.high %v801_v53, %v801_v53  ;;  %v679_v18 = vadd.f32 %v644_v26, %v164_v6  ;;  %v24_v45 = vld [vmem:[%s2082_s0 + $0x80] sm:$0xff] }
  0x27   :  { %v678_v56 = vadd.f32 %v643_v58, %v163_v50  ;;  %v1200_v60 = vmul.f32 %v1043_v8, %v1329_v1  ;;  %v1201_v48 = vmul.f32 %v1047_v31, %v1329_v1  ;;  %v166_v42 = vmul.f32 %v1440_v54, %v1339_v5 }
  0x28   :  { %1277 = vst [vmem:[%s2083_s1 + $0x3f] sm:$0xfe] %v1234_v52  ;;  %v494_v50 = vrot.slane %v248_v59, %v1379_v23  ;;  %v1051_v28 = vrot.slane %v805_v9, %v1379_v23  ;;  %v264_v24 = vcombine.high %v1395_v30, %v1395_v30  ;;  %v714_v38 = vadd.f32 %v679_v18, %v23_v0 }
  0x29   :  { %v713_v3 = vadd.f32 %v678_v56, %v22_v22  ;;  %v821_v6 = vcombine.high %v1505_v39, %v1505_v39  ;;  %v167_v12 = vmul.f32 %v1440_v54, %v1351_v10  ;;  %v272_v5 = vrot.slane %v1395_v30, %v1372_v20 }
  0x2a   :  { %v645_v62 = vmul.f32 %v494_v50, %v1329_v1  ;;  %v1202_v2 = vmul.f32 %v1051_v28, %v1329_v1  ;;  %v286_v17 = vrot.slane %v264_v24, %v1372_v20  ;;  %v1236_v4 = vadd.f32 %v1201_v48, %v714_v38  ;;  %v25_v48 = vld [vmem:[%s2082_s0 + $0x90] sm:$0xff] }
  0x2b   :  { %v1235_v53 = vadd.f32 %v1200_v60, %v713_v3  ;;  %v843_v58 = vrot.slane %v821_v6, %v1372_v20  ;;  %v294_v22 = vcombine.high %v272_v5, %v272_v5  ;;  %v829_v8 = vrot.slane %v1505_v39, %v1372_v20  ;;  %v26_v5 = vld [vmem:[%s2082_s0 + $0x98] sm:$0xff] }
  0x2c   :  { %v680_v30 = vadd.f32 %v645_v62, %v165_v40  ;;  %v498_v26 = vrot.slane %v286_v17, %v1379_v23  ;;  %v168_v31 = vmul.f32 %v1440_v54, %v1356_v11  ;;  %v296_v52 = vcombine.high %v286_v17, %v286_v17  ;;  %1279 = vst [vmem:[%s2083_s1 + $0x4d] sm:$0xfe] %v1236_v4 }
  0x2d   :  { %1278 = vst [vmem:[%s2083_s1 + $0x46] sm:$0xfe] %v1235_v53  ;;  %v1055_v56 = vrot.slane %v843_v58, %v1379_v23  ;;  %v502_v0 = vrot.slane %v294_v22, %v1379_v23  ;;  %v851_v39 = vcombine.high %v829_v8, %v829_v8  ;;  %v853_v59 = vcombine.high %v843_v58, %v843_v58 }
  0x2e   :  { %v715_v9 = vadd.f32 %v680_v30, %v24_v45  ;;  %v646_v60 = vmul.f32 %v498_v26, %v1329_v1  ;;  %v506_v40 = vrot.slane %v296_v52, %v1379_v23  ;;  %v169_v18 = vmul.f32 %v1440_v54, %v1362_v14  ;;  %v27_v45 = vld [vmem:[%s2082_s0 + $0xa0] sm:$0xff] }
  0x2f   :  { %v1203_v3 = vmul.f32 %v1055_v56, %v1329_v1  ;;  %v647_v50 = vmul.f32 %v502_v0, %v1329_v1  ;;  %v1059_v28 = vrot.slane %v851_v39, %v1379_v23  ;;  %v1063_v24 = vrot.slane %v853_v59, %v1379_v23  ;;  %v28_v59 = vld [vmem:[%s2082_s0 + $0xa8] sm:$0xff] }
  0x30   :  { %v1237_v38 = vadd.f32 %v1202_v2, %v715_v9  ;;  %v681_v6 = vadd.f32 %v646_v60, %v166_v42  ;;  %v648_v53 = vmul.f32 %v506_v40, %v1329_v1  ;;  %v279_v62 = vrot.slane %v1399_v32, %v1372_v20 }
  0x31   :  { %v682_v17 = vadd.f32 %v647_v50, %v167_v12  ;;  %v1204_v4 = vmul.f32 %v1059_v28, %v1329_v1  ;;  %v1205_v58 = vmul.f32 %v1063_v24, %v1329_v1  ;;  %v820_v42 = vrot.slane %v806_v35, %v1372_v20 }
  0x32   :  { %1280 = vst [vmem:[%s2083_s1 + $0x54] sm:$0xfe] %v1237_v38  ;;  %v716_v2 = vadd.f32 %v681_v6, %v25_v48  ;;  %v683_v22 = vadd.f32 %v648_v53, %v168_v31  ;;  %v510_v12 = vrot.slane %v279_v62, %v1379_v23  ;;  %v170_v8 = vmul.f32 %v1440_v54, %v1370_v19 }
  0x33   :  { %v717_v30 = vadd.f32 %v682_v17, %v26_v5  ;;  %v836_v26 = vrot.slane %v820_v42, %v1372_v20  ;;  %v265_v52 = vcombine.high %v1399_v32, %v1399_v32  ;;  %v822_v56 = vcombine.high %v820_v42, %v820_v42 }
  0x34   :  { %v1238_v13 = vadd.f32 %v1203_v3, %v716_v2  ;;  %v718_v35 = vadd.f32 %v683_v22, %v27_v45  ;;  %v649_v0 = vmul.f32 %v510_v12, %v1329_v1  ;;  %v171_v39 = vmul.f32 %v1440_v54, %v1377_v21 }
  0x35   :  { %v1239_v31 = vadd.f32 %v1204_v4, %v717_v30  ;;  %v1067_v9 = vrot.slane %v836_v26, %v1379_v23  ;;  %v293_v60 = vrot.slane %v265_v52, %v1372_v20  ;;  %v850_v40 = vrot.slane %v822_v56, %v1372_v20 }
  0x36   :  { %1281 = vst [vmem:[%s2083_s1 + $0x5a] sm:$0xfc] %v1238_v13  ;;  %v1240_v32 = vadd.f32 %v1205_v58, %v718_v35  ;;  %v684_v48 = vadd.f32 %v649_v0, %v169_v18  ;;  %v295_v3 = vcombine.high %v279_v62, %v279_v62  ;;  %v852_v50 = vcombine.high %v836_v26, %v836_v26  ;;  %v30_v26 = vld [vmem:[%s2082_s0 + $0xb8] sm:$0xff] }
  0x37   :  { %1282 = vst [vmem:[%s2083_s1 + $0x60] sm:$0xfc] %v1239_v31  ;;  %v1206_v28 = vmul.f32 %v1067_v9, %v1329_v1  ;;  %v514_v24 = vrot.slane %v293_v60, %v1379_v23  ;;  %v1071_v38 = vrot.slane %v850_v40, %v1379_v23  ;;  %v172_v6 = vmul.f32 %v1440_v54, %v1612_v43  ;;  %v29_v54 = vld [vmem:[%s2082_s0 + $0xb0] sm:$0xff] }
  0x38   :  { %1283 = vst [vmem:[%s2083_s1 + $0x66] sm:$0xfc] %v1240_v32  ;;  %v719_v18 = vadd.f32 %v684_v48, %v28_v59  ;;  %v518_v5 = vrot.slane %v295_v3, %v1379_v23  ;;  %v1075_v53 = vrot.slane %v852_v50, %v1379_v23  ;;  %v297_v62 = vcombine.high %v293_v60, %v293_v60  ;;  %v31_v59 = vld [vmem:[%s2082_s0 + $0xc0] sm:$0xff] }
  0x39   :  { %v650_v17 = vmul.f32 %v514_v24, %v1329_v1  ;;  %v1207_v4 = vmul.f32 %v1071_v38, %v1329_v1  ;;  %v854_v45 = vcombine.high %v850_v40, %v850_v40  ;;  %v173_v58 = vmul.f32 %v1432_v51, %v1351_v10 }
  0x3a   :  { %v1241_v42 = vadd.f32 %v1206_v28, %v719_v18  ;;  %v651_v2 = vmul.f32 %v518_v5, %v1329_v1  ;;  %v1208_v22 = vmul.f32 %v1075_v53, %v1329_v1  ;;  %v522_v12 = vrot.slane %v297_v62, %v1379_v23 }
  0x3b   :  { %v685_v30 = vadd.f32 %v650_v17, %v170_v8  ;;  %v1079_v52 = vrot.slane %v854_v45, %v1379_v23  ;;  %v321_v10 = vrot.slane %v1406_v36, %v1372_v20  ;;  %v878_v56 = vrot.slane %v1482_v16, %v1372_v20 }
  0x3c   :  { %1284 = vst [vmem:[%s2083_s1 + $0x6c] sm:$0xfc] %v1241_v42  ;;  %v686_v13 = vadd.f32 %v651_v2, %v171_v39  ;;  %v652_v35 = vmul.f32 %v522_v12, %v1329_v1  ;;  %v174_v8 = vmul.f32 %v1432_v51, %v1356_v11  ;;  %v313_v0 = vcombine.high %v1406_v36, %v1406_v36 }
  0x3d   :  { %v720_v31 = vadd.f32 %v685_v30, %v29_v54  ;;  %v1209_v9 = vmul.f32 %v1079_v52, %v1329_v1  ;;  %v343_v60 = vcombine.high %v321_v10, %v321_v10  ;;  %v900_v40 = vcombine.high %v878_v56, %v878_v56  ;;  %v33_v10 = vld [vmem:[%s2082_s0 + $0xe0] sm:$0xff] }
  0x3e   :  { %v721_v32 = vadd.f32 %v686_v13, %v30_v26  ;;  %v687_v48 = vadd.f32 %v652_v35, %v172_v6  ;;  %v335_v39 = vrot.slane %v313_v0, %v1372_v20  ;;  %v892_v3 = vrot.slane %v870_v44, %v1372_v20  ;;  %v34_v0 = vld [vmem:[%s2082_s0 + $0xe8] sm:$0xff] }
  0x3f   :  { %v1242_v50 = vadd.f32 %v1207_v4, %v720_v31  ;;  %v526_v36 = vrot.slane %v343_v60, %v1379_v23  ;;  %v1083_v28 = vrot.slane %v900_v40, %v1379_v23  ;;  %v175_v24 = vmul.f32 %v1432_v51, %v1362_v14  ;;  %v32_v4 = vld [vmem:[%s2082_s0 + $0xd8] sm:$0xff] }
  0x40   :  { %v1243_v38 = vadd.f32 %v1208_v22, %v721_v32  ;;  %v722_v18 = vadd.f32 %v687_v48, %v31_v59  ;;  %v345_v5 = vcombine.high %v335_v39, %v335_v39  ;;  %v902_v53 = vcombine.high %v892_v3, %v892_v3 }
  0x41   :  { %1285 = vst [vmem:[%s2083_s1 + $0x72] sm:$0xfc] %v1242_v50  ;;  %v653_v6 = vmul.f32 %v526_v36, %v1329_v1  ;;  %v1210_v16 = vmul.f32 %v1083_v28, %v1329_v1  ;;  %v328_v44 = vrot.slane %v1409_v37, %v1372_v20  ;;  %v869_v62 = vrot.slane %v855_v27, %v1372_v20 }
  0x42   :  { %1286 = vst [vmem:[%s2083_s1 + $0x78] sm:$0xfc] %v1243_v38  ;;  %v1244_v17 = vadd.f32 %v1209_v9, %v722_v18  ;;  %v530_v45 = vrot.slane %v345_v5, %v1379_v23  ;;  %v1087_v42 = vrot.slane %v902_v53, %v1379_v23  ;;  %v176_v54 = vmul.f32 %v1432_v51, %v1370_v19  ;;  %v35_v53 = vld [vmem:[%s2082_s0 + $0xf0] sm:$0xff] }
  0x43   :  { %v688_v2 = vadd.f32 %v653_v6, %v173_v58  ;;  %v534_v7 = vrot.slane %v328_v44, %v1379_v23  ;;  %v885_v27 = vrot.slane %v869_v62, %v1372_v20  ;;  %v314_v22 = vcombine.high %v1409_v37, %v1409_v37 }
  0x44   :  { %1287 = vst [vmem:[%s2083_s1 + $0x7e] sm:$0xfc] %v1244_v17  ;;  %v654_v12 = vmul.f32 %v530_v45, %v1329_v1  ;;  %v1211_v30 = vmul.f32 %v1087_v42, %v1329_v1  ;;  %v871_v26 = vcombine.high %v869_v62, %v869_v62  ;;  %v177_v52 = vmul.f32 %v1432_v51, %v1377_v21  ;;  %v36_v17 = vld [vmem:[%s2082_s0 + $0xf8] sm:$0xff] }
  0x45   :  { %v723_v58 = vadd.f32 %v688_v2, %v32_v4  ;;  %v655_v56 = vmul.f32 %v534_v7, %v1329_v1  ;;  %v1091_v37 = vrot.slane %v885_v27, %v1379_v23  ;;  %v342_v13 = vrot.slane %v314_v22, %v1372_v20 }
  0x46   :  { %v689_v35 = vadd.f32 %v654_v12, %v174_v8  ;;  %v899_v31 = vrot.slane %v871_v26, %v1372_v20  ;;  %v344_v59 = vcombine.high %v328_v44, %v328_v44  ;;  %v901_v9 = vcombine.high %v885_v27, %v885_v27 }
  0x47   :  { %v1245_v60 = vadd.f32 %v1210_v16, %v723_v58  ;;  %v690_v40 = vadd.f32 %v655_v56, %v175_v24  ;;  %v1212_v32 = vmul.f32 %v1091_v37, %v1329_v1  ;;  %v538_v48 = vrot.slane %v342_v13, %v1379_v23 }
  0x48   :  { %v724_v39 = vadd.f32 %v689_v35, %v33_v10  ;;  %v1095_v3 = vrot.slane %v899_v31, %v1379_v23  ;;  %v542_v50 = vrot.slane %v344_v59, %v1379_v23  ;;  %v1099_v8 = vrot.slane %v901_v9, %v1379_v23 }
  0x49   :  { %v2084_v36 = vcombine.high %v1508_v41, %v1508_v41  ;;  %1288 = vst [vmem:[%s2083_s1 + $0x83] sm:$0xf8] %v1245_v60  ;;  %v725_v24 = vadd.f32 %v690_v40, %v34_v0  ;;  %v656_v38 = vmul.f32 %v538_v48, %v1329_v1  ;;  %v346_v18 = vcombine.high %v342_v13, %v342_v13 }
  0x4a   :  { %v1246_v5 = vadd.f32 %v1211_v30, %v724_v39  ;;  %v1213_v6 = vmul.f32 %v1095_v3, %v1329_v1  ;;  %v657_v16 = vmul.f32 %v542_v50, %v1329_v1  ;;  %v178_v41 = vmul.f32 %v1432_v51, %v1612_v43 }
  0x4b   :  { %v1822_v28 = vrot.slane %v2084_v36, %v1372_v20  ;;  %v1247_v44 = vadd.f32 %v1212_v32, %v725_v24  ;;  %v691_v62 = vadd.f32 %v656_v38, %v176_v54  ;;  %v546_v4 = vrot.slane %v346_v18, %v1379_v23 }
  0x4c   :  { %v903_v45 = vcombine.high %v899_v31, %v899_v31  ;;  %1289 = vst [vmem:[%s2083_s1 + $0x88] sm:$0xf8] %v1246_v5  ;;  %v692_v42 = vadd.f32 %v657_v16, %v177_v52  ;;  %v1214_v2 = vmul.f32 %v1099_v8, %v1329_v1  ;;  %v354_v7 = vrot.slane %v1365_v15, %v1372_v20  ;;  %v37_v52 = vld [vmem:[%s2082_s0 + $0x100] sm:$0xff]  ;;  %v39_v16 = vld [vmem:[%s2082_s0 + $0x128] sm:$0xff] }
  0x4d   :  { %v2085_v51 = vcombine.high %v1514_v46, %v1514_v46  ;;  %1290 = vst [vmem:[%s2083_s1 + $0x8d] sm:$0xf8] %v1247_v44  ;;  %v726_v27 = vadd.f32 %v691_v62, %v35_v53  ;;  %v658_v22 = vmul.f32 %v546_v4, %v1329_v1  ;;  %v179_v30 = vmul.f32 %v1458_v63, %v1356_v11 }
  0x4e   :  { %v1103_v12 = vrot.slane %v903_v45, %v1379_v23  ;;  %v727_v26 = vadd.f32 %v692_v42, %v36_v17  ;;  %v362_v58 = vcombine.high %v354_v7, %v354_v7  ;;  %v2086_v10 = vcombine.high %v1365_v15, %v1365_v15  ;;  %v38_v7 = vld [vmem:[%s2082_s0 + $0x120] sm:$0xff] }
  0x4f   :  { %v934_v54 = vrot.slane %v2085_v51, %v1372_v20  ;;  %v1248_v37 = vadd.f32 %v1213_v6, %v726_v27  ;;  %v693_v13 = vadd.f32 %v658_v22, %v178_v41  ;;  %v2087_v11 = vcombine.high %v1499_v34, %v1499_v34 }
  0x50   :  { %v361_v56 = vrot.slane %v2086_v10, %v1372_v20  ;;  %v1215_v35 = vmul.f32 %v1103_v12, %v1329_v1  ;;  %v1249_v31 = vadd.f32 %v1214_v2, %v727_v26  ;;  %v377_v59 = vrot.slane %v362_v58, %v1372_v20 }
  0x51   :  { %v943_v46 = vcombine.high %v934_v54, %v934_v54  ;;  %v918_v0 = vrot.slane %v2087_v11, %v1372_v20  ;;  %1291 = vst [vmem:[%s2083_s1 + $0x92] sm:$0xf8] %v1248_v37  ;;  %v728_v15 = vadd.f32 %v693_v13, %v37_v52  ;;  %v180_v40 = vmul.f32 %v1458_v63, %v1362_v14  ;;  %v40_v52 = vld [vmem:[%s2082_s0 + $0x130] sm:$0xff]  ;;  %v41_v37 = vld [vmem:[%s2082_s0 + $0x138] sm:$0xff] }
  0x52   :  { %v370_v60 = vrot.slane %v361_v56, %v1372_v20  ;;  %v363_v48 = vcombine.high %v361_v56, %v361_v56  ;;  %1292 = vst [vmem:[%s2083_s1 + $0x97] sm:$0xf8] %v1249_v31  ;;  %v386_v34 = vcombine.high %v377_v59, %v377_v59  ;;  %v181_v3 = vmul.f32 %v1458_v63, %v1370_v19 }
  0x53   :  { %v1107_v9 = vrot.slane %v943_v46, %v1379_v23  ;;  %v927_v32 = vrot.slane %v918_v0, %v1372_v20  ;;  %v920_v50 = vcombine.high %v918_v0, %v918_v0  ;;  %v1250_v8 = vadd.f32 %v1215_v35, %v728_v15 }
  0x54   :  { %v554_v39 = vrot.slane %v370_v60, %v1379_v23  ;;  %v384_v38 = vrot.slane %v363_v48, %v1372_v20  ;;  %v550_v18 = vrot.slane %v386_v34, %v1379_v23  ;;  %v385_v6 = vcombine.high %v370_v60, %v370_v60  ;;  %v42_v48 = vld [vmem:[%s2082_s0 + $0x140] sm:$0xff] }
  0x55   :  { %v1216_v36 = vmul.f32 %v1107_v9, %v1329_v1  ;;  %v1111_v24 = vrot.slane %v927_v32, %v1379_v23  ;;  %v941_v53 = vrot.slane %v920_v50, %v1372_v20  ;;  %1293 = vst [vmem:[%s2083_s1 + $0x9c] sm:$0xf8] %v1250_v8  ;;  %v182_v62 = vmul.f32 %v1458_v63, %v1377_v21 }
  0x56   :  { %v660_v5 = vmul.f32 %v554_v39, %v1329_v1  ;;  %v558_v44 = vrot.slane %v384_v38, %v1379_v23  ;;  %v942_v17 = vcombine.high %v927_v32, %v927_v32  ;;  %v659_v4 = vmul.f32 %v550_v18, %v1329_v1 }
  0x57   :  { %v1217_v41 = vmul.f32 %v1111_v24, %v1329_v1  ;;  %v1115_v42 = vrot.slane %v941_v53, %v1379_v23  ;;  %v562_v2 = vrot.slane %v385_v6, %v1379_v23  ;;  %v387_v27 = vcombine.high %v384_v38, %v384_v38 }
  0x58   :  { %v695_v45 = vadd.f32 %v660_v5, %v180_v40  ;;  %v661_v51 = vmul.f32 %v558_v44, %v1329_v1  ;;  %v1119_v54 = vrot.slane %v942_v17, %v1379_v23  ;;  %v944_v22 = vcombine.high %v941_v53, %v941_v53 }
  0x59   :  { %v694_v12 = vadd.f32 %v659_v4, %v179_v30  ;;  %v662_v58 = vmul.f32 %v562_v2, %v1329_v1  ;;  %v183_v46 = vmul.f32 %v1458_v63, %v1612_v43  ;;  %v1218_v56 = vmul.f32 %v1115_v42, %v1329_v1 }
  0x5a   :  { %v730_v26 = vadd.f32 %v695_v45, %v39_v16  ;;  %v696_v10 = vadd.f32 %v661_v51, %v181_v3  ;;  %v566_v13 = vrot.slane %v387_v27, %v1379_v23  ;;  %v1123_v30 = vrot.slane %v944_v22, %v1379_v23 }
  0x5b   :  { %v729_v35 = vadd.f32 %v694_v12, %v38_v7  ;;  %v697_v0 = vadd.f32 %v662_v58, %v182_v62  ;;  %v1219_v31 = vmul.f32 %v1119_v54, %v1329_v1  ;;  %v2088_v63 = vcombine.high %v1520_v49, %v1520_v49  ;;  %v43_v12 = vld [vmem:[%s2082_s0 + $0x168] sm:$0xff] }
  0x5c   :  { %v1252_v11 = vadd.f32 %v1217_v41, %v730_v26  ;;  %v731_v9 = vadd.f32 %v696_v10, %v40_v52  ;;  %v663_v60 = vmul.f32 %v566_v13, %v1329_v1  ;;  %v388_v15 = vcombine.high %v1384_v25, %v1384_v25 }
  0x5d   :  { %v1924_v59 = vrot.slane %v2088_v63, %v1372_v20  ;;  %v1251_v40 = vadd.f32 %v1216_v36, %v729_v35  ;;  %v732_v32 = vadd.f32 %v697_v0, %v41_v37  ;;  %v1220_v49 = vmul.f32 %v1123_v30, %v1329_v1  ;;  %v44_v37 = vld [vmem:[%s2082_s0 + $0x170] sm:$0xff]  ;;  %v45_v63 = vld [vmem:[%s2082_s0 + $0x178] sm:$0xff] }
  0x5e   :  { %1295 = vst [vmem:[%s2083_s1 + $0xa4] sm:$0xf0] %v1252_v11  ;;  %v960_v34 = vrot.slane %v1528_v55, %v1372_v20  ;;  %v1253_v39 = vadd.f32 %v1218_v56, %v731_v9  ;;  %v698_v3 = vadd.f32 %v663_v60, %v183_v46  ;;  %v395_v50 = vrot.slane %v388_v15, %v1372_v20 }
  0x5f   :  { %v953_v25 = vcombine.high %v1528_v55, %v1528_v55  ;;  %1294 = vst [vmem:[%s2083_s1 + $0xa0] sm:$0xf0] %v1251_v40  ;;  %v1254_v8 = vadd.f32 %v1219_v31, %v732_v32  ;;  %v184_v36 = vmul.f32 %v1426_v47, %v1362_v14  ;;  %v185_v14 = vmul.f32 %v1426_v47, %v1370_v19  ;;  %v46_v40 = vld [vmem:[%s2082_s0 + $0x180] sm:$0xff] }
  0x60   :  { %v1127_v24 = vrot.slane %v960_v34, %v1379_v23  ;;  %v968_v38 = vcombine.high %v960_v34, %v960_v34  ;;  %1296 = vst [vmem:[%s2083_s1 + $0xa8] sm:$0xf0] %v1253_v39  ;;  %v733_v18 = vadd.f32 %v698_v3, %v42_v48  ;;  %v403_v5 = vrot.slane %v395_v50, %v1372_v20 }
  0x61   :  { %v396_v53 = vcombine.high %v395_v50, %v395_v50  ;;  %v967_v55 = vrot.slane %v953_v25, %v1372_v20  ;;  %1297 = vst [vmem:[%s2083_s1 + $0xac] sm:$0xf0] %v1254_v8  ;;  %v186_v16 = vmul.f32 %v1426_v47, %v1377_v21  ;;  %v187_v42 = vmul.f32 %v1426_v47, %v1612_v43 }
  0x62   :  { %v1221_v6 = vmul.f32 %v1127_v24, %v1329_v1  ;;  %v1135_v41 = vrot.slane %v968_v38, %v1379_v23  ;;  %v1255_v44 = vadd.f32 %v1220_v49, %v733_v18  ;;  %v570_v62 = vrot.slane %v403_v5, %v1379_v23 }
  0x63   :  { %v410_v17 = vrot.slane %v396_v53, %v1372_v20  ;;  %v1131_v4 = vrot.slane %v967_v55, %v1379_v23  ;;  %v411_v45 = vcombine.high %v403_v5, %v403_v5  ;;  %v969_v2 = vcombine.high %v967_v55, %v967_v55 }
  0x64   :  { %v413_v7 = vcombine.high %v1392_v29, %v1392_v29  ;;  %1298 = vst [vmem:[%s2083_s1 + $0xb0] sm:$0xf0] %v1255_v44  ;;  %v664_v51 = vmul.f32 %v570_v62, %v1329_v1  ;;  %v1223_v27 = vmul.f32 %v1135_v41, %v1329_v1  ;;  %v978_v52 = vcombine.high %v1822_v28, %v1822_v28 }
  0x65   :  { %v574_v54 = vrot.slane %v410_v17, %v1379_v23  ;;  %v412_v22 = vcombine.high %v410_v17, %v410_v17  ;;  %v578_v47 = vrot.slane %v411_v45, %v1379_v23  ;;  %v1139_v26 = vrot.slane %v969_v2, %v1379_v23  ;;  %v48_v17 = vld [vmem:[%s2082_s0 + $0x1b8] sm:$0xff]  ;;  %v1313_v2 = vld [vmem:[%s2083_s1] sm:$0xff] }
  0x66   :  { %v420_v29 = vrot.slane %v413_v7, %v1372_v20  ;;  %v699_v58 = vadd.f32 %v664_v51, %v184_v36  ;;  %v1222_v10 = vmul.f32 %v1131_v4, %v1329_v1  ;;  %v992_v11 = vrot.slane %v978_v52, %v1372_v20 }
  0x67   :  { %v665_v46 = vmul.f32 %v574_v54, %v1329_v1  ;;  %v582_v56 = vrot.slane %v412_v22, %v1379_v23  ;;  %v666_v13 = vmul.f32 %v578_v47, %v1329_v1  ;;  %v1224_v30 = vmul.f32 %v1139_v26, %v1329_v1  ;;  %v49_v47 = vld [vmem:[%s2082_s0 + $0x1c0] sm:$0xff] }
  0x68   :  { %v421_v35 = vcombine.high %v420_v29, %v420_v29  ;;  %v734_v0 = vadd.f32 %v699_v58, %v43_v12  ;;  %v428_v60 = vrot.slane %v420_v29, %v1372_v20  ;;  %v1143_v48 = vrot.slane %v992_v11, %v1379_v23 }
  0x69   :  { %v700_v31 = vadd.f32 %v665_v46, %v185_v14  ;;  %v667_v9 = vmul.f32 %v582_v56, %v1329_v1  ;;  %v701_v15 = vadd.f32 %v666_v13, %v186_v16  ;;  %v985_v49 = vrot.slane %v1822_v28, %v1372_v20  ;;  %v47_v16 = vld [vmem:[%s2082_s0 + $0x1b0] sm:$0xff] }
  0x6a   :  { %v435_v32 = vrot.slane %v421_v35, %v1372_v20  ;;  %v1256_v34 = vadd.f32 %v1221_v6, %v734_v0  ;;  %v436_v50 = vcombine.high %v428_v60, %v428_v60  ;;  %v188_v8 = vmul.f32 %v1445_v57, %v1370_v19  ;;  %v1314_v35 = vld [vmem:[%s2082_s0 + $0x38] sm:$0xff] }
  0x6b   :  { %v735_v39 = vadd.f32 %v700_v31, %v44_v37  ;;  %v702_v3 = vadd.f32 %v667_v9, %v187_v42  ;;  %v736_v25 = vadd.f32 %v701_v15, %v45_v63  ;;  %v993_v24 = vcombine.high %v985_v49, %v985_v49 }
  0x6c   :  { %v586_v36 = vrot.slane %v435_v32, %v1379_v23  ;;  %1299 = vst [vmem:[%s2083_s1 + $0xb3] sm:$0xe0] %v1256_v34  ;;  %v189_v28 = vmul.f32 %v1445_v57, %v1377_v21  ;;  %v590_v5 = vrot.slane %v436_v50, %v1379_v23  ;;  %v437_v19 = vcombine.high %v435_v32, %v435_v32 }
  0x6d   :  { %v1257_v38 = vadd.f32 %v1222_v10, %v735_v39  ;;  %v737_v18 = vadd.f32 %v702_v3, %v46_v40  ;;  %v1258_v53 = vadd.f32 %v1223_v27, %v736_v25  ;;  %v1147_v6 = vrot.slane %v993_v24, %v1379_v23  ;;  %v51_v3 = vld [vmem:[%s2082_s0 + $0x200] sm:$0xff] }
  0x6e   :  { %v668_v55 = vmul.f32 %v586_v36, %v1329_v1  ;;  %v1225_v41 = vmul.f32 %v1143_v48, %v1329_v1  ;;  %v669_v21 = vmul.f32 %v590_v5, %v1329_v1  ;;  %v994_v44 = vcombine.high %v992_v11, %v992_v11  ;;  %v50_v48 = vld [vmem:[%s2082_s0 + $0x1f8] sm:$0xff] }
  0x6f   :  { %1300 = vst [vmem:[%s2083_s1 + $0xb6] sm:$0xe0] %v1257_v38  ;;  %v1259_v14 = vadd.f32 %v1224_v30, %v737_v18  ;;  %1301 = vst [vmem:[%s2083_s1 + $0xb9] sm:$0xe0] %v1258_v53  ;;  %v190_v4 = vmul.f32 %v1445_v57, %v1612_v43  ;;  %v594_v45 = vrot.slane %v437_v19, %v1379_v23 }
  0x70   :  { %v703_v62 = vadd.f32 %v668_v55, %v188_v8  ;;  %v438_v42 = vcombine.high %v1402_v33, %v1402_v33  ;;  %v704_v1 = vadd.f32 %v669_v21, %v189_v28  ;;  %v1226_v7 = vmul.f32 %v1313_v2, %v1147_v6 }
  0x71   :  { %1302 = vst [vmem:[%s2083_s1 + $0xbc] sm:$0xe0] %v1259_v14  ;;  %v1151_v51 = vrot.slane %v994_v44, %v1379_v23  ;;  %v1010_v57 = vrot.slane %v1924_v59, %v1372_v20  ;;  %v670_v27 = vmul.f32 %v1313_v2, %v594_v45  ;;  %v1003_v33 = vcombine.high %v1924_v59, %v1924_v59 }
  0x72   :  { %v738_v54 = vadd.f32 %v703_v62, %v47_v16  ;;  %v445_v22 = vrot.slane %v438_v42, %v1372_v20  ;;  %v739_v12 = vadd.f32 %v704_v1, %v48_v17  ;;  %v191_v11 = vmul.f32 %v1314_v35, %v1453_v61 }
  0x73   :  { %v1227_v26 = vmul.f32 %v1313_v2, %v1151_v51  ;;  %v1018_v29 = vcombine.high %v1010_v57, %v1010_v57  ;;  %v705_v58 = vadd.f32 %v670_v27, %v190_v4  ;;  %v1017_v37 = vrot.slane %v1003_v33, %v1372_v20 }
  0x74   :  { %v1260_v52 = vadd.f32 %v1225_v41, %v738_v54  ;;  %v453_v46 = vrot.slane %v445_v22, %v1372_v20  ;;  %v446_v10 = vcombine.high %v445_v22, %v445_v22  ;;  %v1261_v56 = vadd.f32 %v1226_v7, %v739_v12 }
  0x75   :  { %v740_v59 = vadd.f32 %v705_v58, %v49_v47  ;;  %v1019_v0 = vcombine.high %v1017_v37, %v1017_v37  ;;  %v1155_v9 = vrot.slane %v1018_v29, %v1379_v23  ;;  %v192_v15 = vmul.f32 %v1453_v61, %v1612_v43 }
  0x76   :  { %1303 = vst [vmem:[%s2083_s1 + $0xbe] sm:$0xc0] %v1260_v52  ;;  %v461_v13 = vcombine.high %v453_v46, %v453_v46  ;;  %v460_v30 = vrot.slane %v446_v10, %v1372_v20  ;;  %1304 = vst [vmem:[%s2083_s1 + $0xc0] sm:$0xc0] %v1261_v56 }
  0x77   :  { %v1262_v31 = vadd.f32 %v1227_v26, %v740_v59  ;;  %v1159_v32 = vrot.slane %v1019_v0, %v1379_v23  ;;  %v1228_v34 = vmul.f32 %v1313_v2, %v1155_v9 }
  0x78   :  { %v598_v63 = vrot.slane %v461_v13, %v1379_v23  ;;  %v462_v60 = vcombine.high %v460_v30, %v460_v30 }
  0x79   :  { %1305 = vst [vmem:[%s2083_s1 + $0xc2] sm:$0xc0] %v1262_v31  ;;  %v1229_v8 = vmul.f32 %v1313_v2, %v1159_v32 }
  0x7a   :  { %v671_v20 = vmul.f32 %v1313_v2, %v598_v63  ;;  %v602_v40 = vrot.slane %v462_v60, %v1379_v23 }
  0x7c   :  { %v706_v49 = vadd.f32 %v671_v20, %v191_v11  ;;  %v672_v39 = vmul.f32 %v1313_v2, %v602_v40 }
  0x7e   :  { %v741_v50 = vadd.f32 %v706_v49, %v50_v48  ;;  %v707_v25 = vadd.f32 %v672_v39, %v192_v15 }
  0x80   :  { %v1263_v36 = vadd.f32 %v1228_v34, %v741_v50  ;;  %v742_v61 = vadd.f32 %v707_v25, %v51_v3 }
  0x82   :  { %1306 = vst [vmem:[%s2083_s1 + $0xc3] sm:$0x80] %v1263_v36  ;;  %v1264_v23 = vadd.f32 %v1229_v8, %v742_v61 }
  0x84   :  { %1307 = vst [vmem:[%s2083_s1 + $0xc4] sm:$0x80] %v1264_v23 }

</bundles_post_ra>
